<compile_context>
chip_gen: v7x
topology: tpu7x:2x2x1
jax: 0.10.0
libtpu: 0.0.40
codegen_flags: <defaults>
</compile_context>

<pallas_src>
import functools

import jax
import jax.numpy as jnp
from jax import lax
from jax.experimental import pallas as pl
from jax.experimental.pallas import tpu as pltpu

HIDDEN = 64


def _round_up(x, m):
    return (x + m - 1) // m * m


# ----------------------------------------------------------------------------- kernel
def _make_kernel(action_dim):
    def kernel(x_ref, w1_ref, b1_ref, w2_ref, b2_ref, w3_ref, b3_ref, out_ref):
        bf16 = jnp.bfloat16
        x = x_ref[...].astype(bf16)                               # (TB, S) bf16

        # fused actor|critic MLP: Linear -> Tanh -> Linear -> Tanh -> Linear
        # bf16 MXU operands, f32 accumulation, f32 elementwise.
        h1 = jnp.tanh(jnp.dot(x, w1_ref[...],
                              preferred_element_type=jnp.float32) + b1_ref[...])
        h2 = jnp.tanh(jnp.dot(h1.astype(bf16), w2_ref[...],
                              preferred_element_type=jnp.float32) + b2_ref[...])
        logits = (jnp.dot(h2.astype(bf16), w3_ref[...],
                          preferred_element_type=jnp.float32) + b3_ref[...])  # (TB, OUT_W)

        col = lax.broadcasted_iota(jnp.int32, logits.shape, 1)
        valid = col < action_dim                                  # actor-logit lanes

        # masked, numerically-stable log-softmax over the actor lanes (f32)
        neg = jnp.float32(-1e30)
        masked = jnp.where(valid, logits, neg)
        m = jnp.max(masked, axis=-1, keepdims=True)
        shifted = masked - m
        e = jnp.where(valid, jnp.exp(shifted), 0.0)
        s = jnp.sum(e, axis=-1, keepdims=True)
        log_s = jnp.log(s)
        log_probs = shifted - log_s

        # entropy = -(p*log p).sum = log(s) - (1/s) * sum(e * shifted); reciprocal on EUP
        inv_s = pl.reciprocal(s, approx=True)
        entropy = log_s - jnp.sum(e * shifted, axis=-1, keepdims=True) * inv_s

        # pack [log_probs | entropy | value | 0...] into one lane-dense slab.
        # critic head lives in logits column action_dim+1 already.
        out = jnp.where(valid, log_probs, 0.0)
        out = out + jnp.where(col == action_dim, entropy, 0.0)
        out = out + jnp.where(col == action_dim + 1, logits, 0.0)
        out_ref[...] = out

    return kernel


@functools.lru_cache(maxsize=None)
def _build_call(padded_b, tb, state_dim, out_w, action_dim):
    hidden2 = 2 * HIDDEN
    grid_b = pl.cdiv(padded_b, tb)
    const = lambda i: (0, 0)

    flops = 2 * padded_b * (state_dim * hidden2 + hidden2 * hidden2 + hidden2 * out_w)
    transcendentals = padded_b * (2 * hidden2 + out_w + 2)        # 2x tanh + exp + log/rcp
    bytes_accessed = (padded_b * state_dim * 4                    # state tiles (f32)
                      + 2 * (state_dim * hidden2 + hidden2 * hidden2 + hidden2 * out_w)
                      + 4 * (2 * hidden2 + out_w)                 # f32 biases
                      + padded_b * out_w * 4)                     # output slab

    return pl.pallas_call(
        _make_kernel(action_dim),
        out_shape=jax.ShapeDtypeStruct((padded_b, out_w), jnp.float32),
        grid=(grid_b,),
        in_specs=[
            pl.BlockSpec((tb, state_dim), lambda i: (i, 0)),      # state tile (f32)
            pl.BlockSpec((state_dim, hidden2), const),            # W1 bf16 (resident)
            pl.BlockSpec((1, hidden2), const),                    # b1 f32
            pl.BlockSpec((hidden2, hidden2), const),              # W2 bf16 (block-diag)
            pl.BlockSpec((1, hidden2), const),                    # b2 f32
            pl.BlockSpec((hidden2, out_w), const),                # W3 bf16 (fused heads)
            pl.BlockSpec((1, out_w), const),                      # b3 f32
        ],
        out_specs=pl.BlockSpec((tb, out_w), lambda i: (i, 0)),
        compiler_params=pltpu.CompilerParams(
            dimension_semantics=("parallel",)),
        cost_estimate=pl.CostEstimate(
            flops=flops, transcendentals=transcendentals,
            bytes_accessed=bytes_accessed),
    )


# ----------------------------------------------------------------------------- params
def init_params(key, state_dim, action_dim, hidden=HIDDEN):
    """Raw per-layer params (same shapes/semantics as the PyTorch module)."""
    ks = jax.random.split(key, 12)
    f32 = jnp.float32

    def lin(kw, kb, fan_in, fan_out):
        bound = 1.0 / jnp.sqrt(jnp.asarray(fan_in, f32))
        w = jax.random.uniform(kw, (fan_in, fan_out), f32, -bound, bound)
        b = jax.random.uniform(kb, (1, fan_out), f32, -bound, bound)
        return w, b

    w1a, b1a = lin(ks[0], ks[1], state_dim, hidden)
    w2a, b2a = lin(ks[2], ks[3], hidden, hidden)
    w3a, b3a = lin(ks[4], ks[5], hidden, action_dim)
    w1c, b1c = lin(ks[6], ks[7], state_dim, hidden)
    w2c, b2c = lin(ks[8], ks[9], hidden, hidden)
    w3c, b3c = lin(ks[10], ks[11], hidden, 1)
    return (w1a, b1a, w2a, b2a, w3a, b3a, w1c, b1c, w2c, b2c, w3c, b3c)


def fuse_params(params, action_dim, hidden=HIDDEN):
    """Fuse actor+critic into three 128-wide layers; weights bf16, biases f32."""
    (w1a, b1a, w2a, b2a, w3a, b3a, w1c, b1c, w2c, b2c, w3c, b3c) = params
    f32, bf16 = jnp.float32, jnp.bfloat16
    h2 = 2 * hidden
    out_w = max(128, _round_up(action_dim + 2, 128))

    W1 = jnp.concatenate([w1a, w1c], axis=1).astype(bf16)         # (state_dim, 128)
    B1 = jnp.concatenate([b1a, b1c], axis=1).astype(f32)          # (1, 128)

    W2 = jnp.zeros((h2, h2), f32)
    W2 = W2.at[:hidden, :hidden].set(w2a)
    W2 = W2.at[hidden:, hidden:].set(w2c)                         # block-diagonal
    W2 = W2.astype(bf16)
    B2 = jnp.concatenate([b2a, b2c], axis=1).astype(f32)

    W3 = jnp.zeros((h2, out_w), f32)
    W3 = W3.at[:hidden, :action_dim].set(w3a)                     # actor head
    W3 = W3.at[hidden:, action_dim + 1:action_dim + 2].set(w3c)   # critic -> lane A+1
    W3 = W3.astype(bf16)
    B3 = jnp.zeros((1, out_w), f32)
    B3 = B3.at[:, :action_dim].set(b3a)
    B3 = B3.at[:, action_dim + 1:action_dim + 2].set(b3c)
    return (W1, B1, W2, B2, W3, B3)


# ----------------------------------------------------------------------------- wrappers
def _pick_tb(b):
    if b <= 8:
        return 8
    # >=2 grid steps so v7x can shard the batch across both TensorCores; cap the tile
    # at 2048 rows (per-tile VMEM ~2.5 MiB, far inside v7x's 64 MiB).
    return min(2048, _round_up(pl.cdiv(b, 2), 8))


def _fused_forward(state, fused, action_dim):
    """Returns (log_probs (B, A), entropy (B,), value (B,))."""
    W1, B1, W2, B2, W3, B3 = fused
    b, state_dim = state.shape
    out_w = W3.shape[1]
    tb = _pick_tb(b)
    pb = _round_up(b, 8)                 # sublane-only pad; ragged tiles handled by Pallas
    if pb != b:
        state = jnp.pad(state, ((0, pb - b), (0, 0)))
    call = _build_call(pb, tb, state_dim, out_w, action_dim)
    slab = call(state, W1, B1, W2, B2, W3, B3)
    log_probs = slab[:b, :action_dim]
    entropy = slab[:b, action_dim]
    value = slab[:b, action_dim + 1]
    return log_probs, entropy, value


@functools.partial(jax.jit, static_argnames=("action_dim",))
def evaluate(state, action, fused, *, action_dim):
    """Mirrors ActorCritic.evaluate(state, action)."""
    log_probs, entropy, value = _fused_forward(state, fused, action_dim)
    alp = jnp.take_along_axis(
        log_probs, action[:, None].astype(jnp.int32), axis=-1)[:, 0]
    return alp, value, entropy


@functools.partial(jax.jit, static_argnames=("action_dim",))
def policy_logprobs(state, fused, *, action_dim):
    log_probs, _, _ = _fused_forward(state, fused, action_dim)
    return log_probs


def act(state_row, key, fused, action_dim):
    """Mirrors ActorCritic.act(state): Categorical sampling done in JAX glue."""
    log_probs = policy_logprobs(state_row[None, :], fused, action_dim=action_dim)[0]
    action = jax.random.categorical(key, log_probs)
    return action, log_probs[action]


# ----------------------------------------------------------------------------- demo
if __name__ == "__main__":
    STATE_DIM, ACTION_DIM = 32, 8

    key = jax.random.PRNGKey(0)
    k_param, k_state, k_act = jax.random.split(key, 3)

    params = init_params(k_param, STATE_DIM, ACTION_DIM)
    fused = fuse_params(params, ACTION_DIM)
    (w1a, b1a, w2a, b2a, w3a, b3a, w1c, b1c, w2c, b2c, w3c, b3c) = params

    def mlp_f32(x, w1, b1, w2, b2, w3, b3):
        h = jnp.tanh(x @ w1 + b1)
        h = jnp.tanh(h @ w2 + b2)
        return h @ w3 + b3

    def mlp_mixed(x, w1, b1, w2, b2, w3, b3):
        # same precision recipe as the kernel: bf16 MXU operands, f32 accum/elementwise
        bf = jnp.bfloat16
        d = functools.partial(jnp.dot, preferred_element_type=jnp.float32)
        h = jnp.tanh(d(x.astype(bf), w1.astype(bf)) + b1)
        h = jnp.tanh(d(h.astype(bf), w2.astype(bf)) + b2)
        return d(h.astype(bf), w3.astype(bf)) + b3

    saved = {}
    for B in (8, 48):                    # single-tile path and 2-step (megacore) path
        kb = jax.random.fold_in(k_state, B)
        ks, ka = jax.random.split(kb)
        state = jax.random.normal(ks, (B, STATE_DIM), dtype=jnp.float32)
        action = jax.random.randint(ka, (B,), 0, ACTION_DIM)

        alp, values, ent = evaluate(state, action, fused, action_dim=ACTION_DIM)
        jax.block_until_ready((alp, values, ent))

        # reference 1: matched mixed precision (tight)
        logits_mx = mlp_mixed(state, w1a, b1a, w2a, b2a, w3a, b3a)
        logp_mx = jax.nn.log_softmax(logits_mx, axis=-1)
        value_mx = mlp_mixed(state, w1c, b1c, w2c, b2c, w3c, b3c)[:, 0]
        ent_mx = -jnp.sum(jnp.exp(logp_mx) * logp_mx, axis=-1)
        alp_mx = jnp.take_along_axis(logp_mx, action[:, None], axis=-1)[:, 0]

        # reference 2: pure-f32 module semantics (loose; bf16 weight quantization)
        logits_f = mlp_f32(state, w1a, b1a, w2a, b2a, w3a, b3a)
        logp_f = jax.nn.log_softmax(logits_f, axis=-1)
        value_f = mlp_f32(state, w1c, b1c, w2c, b2c, w3c, b3c)[:, 0]
        ent_f = -jnp.sum(jnp.exp(logp_f) * logp_f, axis=-1)
        alp_f = jnp.take_along_axis(logp_f, action[:, None], axis=-1)[:, 0]

        assert jnp.allclose(alp, alp_mx, atol=1e-3), "logprob (matched) mismatch"
        assert jnp.allclose(values, value_mx, atol=1e-3), "value (matched) mismatch"
        # entropy tolerance relaxed (approx reciprocal on EUP), per review
        assert jnp.allclose(ent, ent_mx, atol=2e-2), "entropy (matched) mismatch"
        assert jnp.allclose(alp, alp_f, atol=5e-2), "logprob (f32 ref) mismatch"
        assert jnp.allclose(values, value_f, atol=5e-2), "value (f32 ref) mismatch"
        assert jnp.allclose(ent, ent_f, atol=5e-2), "entropy (f32 ref) mismatch"

        saved[B] = (state, logp_mx)

    # act() path on a single state (padded to one 8-row tile inside the wrapper)
    state8, logp8 = saved[8]
    a, lp = act(state8[0], k_act, fused, ACTION_DIM)
    jax.block_until_ready((a, lp))
    assert jnp.allclose(lp, logp8[0, int(a)], atol=1e-3)

    print("KERNEL_OK")
</pallas_src>

<mosaic_0001>
module attributes {stable_mosaic.version = 11 : i64} {
  func.func @kernel(%arg0: i32, %arg1: memref<8x32xf32, #tpu.memory_space<vmem>>, %arg2: memref<32x128xbf16, #tpu.memory_space<vmem>>, %arg3: memref<1x128xf32, #tpu.memory_space<vmem>>, %arg4: memref<128x128xbf16, #tpu.memory_space<vmem>>, %arg5: memref<1x128xf32, #tpu.memory_space<vmem>>, %arg6: memref<128x128xbf16, #tpu.memory_space<vmem>>, %arg7: memref<1x128xf32, #tpu.memory_space<vmem>>, %arg8: memref<8x128xf32, #tpu.memory_space<vmem>>) attributes {dimension_semantics = [#tpu.dimension_semantics<parallel>], iteration_bounds = array<i64: 1>, scalar_prefetch = 0 : i64, scratch_operands = 0 : i64, tpu.core_type = #tpu.core_type<tc>, window_params = [{transform_indices = @transform_0, window_bounds = array<i64: 8, 32>}, {pipeline_mode = #tpu.pipeline_mode<synchronous>, transform_indices = @transform_1, window_bounds = array<i64: 32, 128>}, {pipeline_mode = #tpu.pipeline_mode<synchronous>, transform_indices = @transform_2, window_bounds = array<i64: 1, 128>}, {pipeline_mode = #tpu.pipeline_mode<synchronous>, transform_indices = @transform_3, window_bounds = array<i64: 128, 128>}, {pipeline_mode = #tpu.pipeline_mode<synchronous>, transform_indices = @transform_4, window_bounds = array<i64: 1, 128>}, {pipeline_mode = #tpu.pipeline_mode<synchronous>, transform_indices = @transform_5, window_bounds = array<i64: 128, 128>}, {pipeline_mode = #tpu.pipeline_mode<synchronous>, transform_indices = @transform_6, window_bounds = array<i64: 1, 128>}, {transform_indices = @transform_7, window_bounds = array<i64: 8, 128>}]} {
    %c0 = arith.constant 0 : index
    %c0_0 = arith.constant 0 : index
    %0 = vector.load %arg1[%c0, %c0_0] : memref<8x32xf32, #tpu.memory_space<vmem>>, vector<8x32xf32>
    %1 = arith.truncf %0 : vector<8x32xf32> to vector<8x32xbf16>
    %c0_1 = arith.constant 0 : index
    %c0_2 = arith.constant 0 : index
    %2 = vector.load %arg2[%c0_1, %c0_2] : memref<32x128xbf16, #tpu.memory_space<vmem>>, vector<32x128xbf16>
    %cst = arith.constant dense<0.000000e+00> : vector<8x128xf32>
    %3 = tpu.matmul %1, %2, %cst {dimension_numbers = #tpu.dot_dimension_numbers<[1], [0], [0], [1], [0, 0, 1, 1], [], []>} : vector<8x32xbf16>, vector<32x128xbf16>, vector<8x128xf32> -> vector<8x128xf32>
    %c0_3 = arith.constant 0 : index
    %c0_4 = arith.constant 0 : index
    %4 = vector.load %arg3[%c0_3, %c0_4] : memref<1x128xf32, #tpu.memory_space<vmem>>, vector<1x128xf32>
    %5 = vector.broadcast %4 : vector<1x128xf32> to vector<8x128xf32>
    %6 = arith.addf %3, %5 : vector<8x128xf32>
    %7 = math.tanh %6 : vector<8x128xf32>
    %8 = arith.truncf %7 : vector<8x128xf32> to vector<8x128xbf16>
    %c0_5 = arith.constant 0 : index
    %c0_6 = arith.constant 0 : index
    %9 = vector.load %arg4[%c0_5, %c0_6] : memref<128x128xbf16, #tpu.memory_space<vmem>>, vector<128x128xbf16>
    %cst_7 = arith.constant dense<0.000000e+00> : vector<8x128xf32>
    %10 = tpu.matmul %8, %9, %cst_7 {dimension_numbers = #tpu.dot_dimension_numbers<[1], [0], [0], [1], [0, 0, 1, 1], [], []>} : vector<8x128xbf16>, vector<128x128xbf16>, vector<8x128xf32> -> vector<8x128xf32>
    %c0_8 = arith.constant 0 : index
    %c0_9 = arith.constant 0 : index
    %11 = vector.load %arg5[%c0_8, %c0_9] : memref<1x128xf32, #tpu.memory_space<vmem>>, vector<1x128xf32>
    %12 = vector.broadcast %11 : vector<1x128xf32> to vector<8x128xf32>
    %13 = arith.addf %10, %12 : vector<8x128xf32>
    %14 = math.tanh %13 : vector<8x128xf32>
    %15 = arith.truncf %14 : vector<8x128xf32> to vector<8x128xbf16>
    %c0_10 = arith.constant 0 : index
    %c0_11 = arith.constant 0 : index
    %16 = vector.load %arg6[%c0_10, %c0_11] : memref<128x128xbf16, #tpu.memory_space<vmem>>, vector<128x128xbf16>
    %cst_12 = arith.constant dense<0.000000e+00> : vector<8x128xf32>
    %17 = tpu.matmul %15, %16, %cst_12 {dimension_numbers = #tpu.dot_dimension_numbers<[1], [0], [0], [1], [0, 0, 1, 1], [], []>} : vector<8x128xbf16>, vector<128x128xbf16>, vector<8x128xf32> -> vector<8x128xf32>
    %c0_13 = arith.constant 0 : index
    %c0_14 = arith.constant 0 : index
    %18 = vector.load %arg7[%c0_13, %c0_14] : memref<1x128xf32, #tpu.memory_space<vmem>>, vector<1x128xf32>
    %19 = vector.broadcast %18 : vector<1x128xf32> to vector<8x128xf32>
    %20 = arith.addf %17, %19 : vector<8x128xf32>
    %21 = tpu.iota {dimensions = array<i32: 1>} : vector<8x128xi32>
    %c8_i32 = arith.constant 8 : i32
    %22 = vector.broadcast %c8_i32 : i32 to vector<8x128xi32>
    %23 = arith.cmpi slt, %21, %22 : vector<8x128xi32>
    %cst_15 = arith.constant -1.000000e+30 : f32
    %24 = vector.broadcast %cst_15 : f32 to vector<8x128xf32>
    %25 = arith.select %23, %20, %24 : vector<8x128xi1>, vector<8x128xf32>
    %cst_16 = arith.constant dense<0xFF800000> : vector<8xf32>
    %26 = vector.multi_reduction <maximumf>, %25, %cst_16 [1] : vector<8x128xf32> to vector<8xf32>
    %27 = vector.shape_cast %26 : vector<8xf32> to vector<8x1xf32>
    %28 = vector.broadcast %27 : vector<8x1xf32> to vector<8x128xf32>
    %29 = arith.subf %25, %28 : vector<8x128xf32>
    %30 = math.exp %29 : vector<8x128xf32>
    %cst_17 = arith.constant 0.000000e+00 : f32
    %31 = vector.broadcast %cst_17 : f32 to vector<8x128xf32>
    %32 = arith.select %23, %30, %31 : vector<8x128xi1>, vector<8x128xf32>
    %cst_18 = arith.constant dense<0.000000e+00> : vector<8xf32>
    %33 = vector.multi_reduction <add>, %32, %cst_18 [1] : vector<8x128xf32> to vector<8xf32>
    %34 = vector.shape_cast %33 : vector<8xf32> to vector<8x1xf32>
    %35 = math.log %34 : vector<8x1xf32>
    %36 = vector.broadcast %35 : vector<8x1xf32> to vector<8x128xf32>
    %37 = arith.subf %29, %36 : vector<8x128xf32>
    %38 = tpu.reciprocal %34 {approx = true} : vector<8x1xf32> -> vector<8x1xf32>
    %39 = arith.mulf %32, %29 : vector<8x128xf32>
    %cst_19 = arith.constant dense<0.000000e+00> : vector<8xf32>
    %40 = vector.multi_reduction <add>, %39, %cst_19 [1] : vector<8x128xf32> to vector<8xf32>
    %41 = vector.shape_cast %40 : vector<8xf32> to vector<8x1xf32>
    %42 = arith.mulf %41, %38 : vector<8x1xf32>
    %43 = arith.subf %35, %42 : vector<8x1xf32>
    %cst_20 = arith.constant 0.000000e+00 : f32
    %44 = vector.broadcast %cst_20 : f32 to vector<8x128xf32>
    %45 = arith.select %23, %37, %44 : vector<8x128xi1>, vector<8x128xf32>
    %c8_i32_21 = arith.constant 8 : i32
    %46 = vector.broadcast %c8_i32_21 : i32 to vector<8x128xi32>
    %47 = arith.cmpi eq, %21, %46 : vector<8x128xi32>
    %cst_22 = arith.constant 0.000000e+00 : f32
    %48 = vector.shape_cast %43 : vector<8x1xf32> to vector<8x1xf32>
    %49 = vector.broadcast %48 : vector<8x1xf32> to vector<8x128xf32>
    %50 = vector.broadcast %cst_22 : f32 to vector<8x128xf32>
    %51 = arith.select %47, %49, %50 : vector<8x128xi1>, vector<8x128xf32>
    %52 = arith.addf %45, %51 : vector<8x128xf32>
    %c9_i32 = arith.constant 9 : i32
    %53 = vector.broadcast %c9_i32 : i32 to vector<8x128xi32>
    %54 = arith.cmpi eq, %21, %53 : vector<8x128xi32>
    %cst_23 = arith.constant 0.000000e+00 : f32
    %55 = vector.broadcast %cst_23 : f32 to vector<8x128xf32>
    %56 = arith.select %54, %20, %55 : vector<8x128xi1>, vector<8x128xf32>
    %57 = arith.addf %52, %56 : vector<8x128xf32>
    %c0_24 = arith.constant 0 : index
    %c0_25 = arith.constant 0 : index
    %58 = vector.load %arg8[%c0_24, %c0_25] : memref<8x128xf32, #tpu.memory_space<vmem>>, vector<8x128xf32>
    tpu.vector_store %arg8[%c0_24, %c0_25], %57 {strides = array<i32>} : memref<8x128xf32, #tpu.memory_space<vmem>>, vector<8x128xf32>,
    return
  }
  func.func @transform_0(%arg0: i32) -> (i32, i32) {
    %c0_i32 = arith.constant 0 : i32
    %c0_i32_0 = arith.constant 0 : i32
    return %arg0, %c0_i32 : i32, i32
  }
  func.func @transform_1(%arg0: i32) -> (i32, i32) {
    %c0_i32 = arith.constant 0 : i32
    %c0_i32_0 = arith.constant 0 : i32
    %c0_i32_1 = arith.constant 0 : i32
    return %c0_i32, %c0_i32_0 : i32, i32
  }
  func.func @transform_2(%arg0: i32) -> (i32, i32) {
    %c0_i32 = arith.constant 0 : i32
    %c0_i32_0 = arith.constant 0 : i32
    %c0_i32_1 = arith.constant 0 : i32
    return %c0_i32, %c0_i32_0 : i32, i32
  }
  func.func @transform_3(%arg0: i32) -> (i32, i32) {
    %c0_i32 = arith.constant 0 : i32
    %c0_i32_0 = arith.constant 0 : i32
    %c0_i32_1 = arith.constant 0 : i32
    return %c0_i32, %c0_i32_0 : i32, i32
  }
  func.func @transform_4(%arg0: i32) -> (i32, i32) {
    %c0_i32 = arith.constant 0 : i32
    %c0_i32_0 = arith.constant 0 : i32
    %c0_i32_1 = arith.constant 0 : i32
    return %c0_i32, %c0_i32_0 : i32, i32
  }
  func.func @transform_5(%arg0: i32) -> (i32, i32) {
    %c0_i32 = arith.constant 0 : i32
    %c0_i32_0 = arith.constant 0 : i32
    %c0_i32_1 = arith.constant 0 : i32
    return %c0_i32, %c0_i32_0 : i32, i32
  }
  func.func @transform_6(%arg0: i32) -> (i32, i32) {
    %c0_i32 = arith.constant 0 : i32
    %c0_i32_0 = arith.constant 0 : i32
    %c0_i32_1 = arith.constant 0 : i32
    return %c0_i32, %c0_i32_0 : i32, i32
  }
  func.func @transform_7(%arg0: i32) -> (i32, i32) {
    %c0_i32 = arith.constant 0 : i32
    %c0_i32_0 = arith.constant 0 : i32
    return %arg0, %c0_i32 : i32, i32
  }
}

</mosaic_0001>

<bundles_post_ra>
// kernel: evaluate.1
= control target key start
LH: loop header
LB: loop body
LE: loop exit
PB: predicated region body
PF: predicated region fallthrough
CT: control target
= control target key end

     0   :  { %12 = vsyncpa [#allocation3], 0  ;;  %s726_s0 = inlined_call_operand.hbm [shape: f32[8,32], index: 0, kind: input, shape index: {}]   ;;  %s727_s1 = inlined_call_operand.vmem [shape: bf16[32,128], index: 1, kind: input, shape index: {}]   ;;  %s728_s2 = inlined_call_operand.vmem [shape: f32[1,128], index: 2, kind: input, shape index: {}]   ;;  %s729_s3 = inlined_call_operand.hbm [shape: bf16[128,128], index: 3, kind: input, shape index: {}]   ;;  %s730_s4 = inlined_call_operand.vmem [shape: f32[1,128], index: 4, kind: input, shape index: {}]   ;;  %s731_s5 = inlined_call_operand.hbm [shape: bf16[128,128], index: 5, kind: input, shape index: {}]   ;;  %s732_s6 = inlined_call_operand.vmem [shape: f32[1,128], index: 6, kind: input, shape index: {}]   ;;  %s733_s7 = inlined_call_operand.vmem [shape: f32[8,128], index: 7, kind: output, shape index: {}]  }
   0x1   :  { %13 = vsyncpa [#allocation5], 0  ;;  %s592_s24 = smov [#allocation4]   ;;  %s522_s28 = scalar_lea.hbm %s729_s3, 1024 }
   0x2   :  { %s33_s25 = sshll.u32 %s592_s24, 4  ;;  %p523_p0 = scmp.ne.s32.totalorder %s729_s3, %s522_s28  ;;  %s34_s25 = int_to_ptr.vmem [resolvable:$true] %s33_s25 }
   0x3   :  { %p526_p1 = scmp.lt.u32.totalorder %s522_s28, %s729_s3 }
   0x5   :  { %p528_p2 = pnand %p526_p1, %p523_p0 }
   0x7   :  { %531 = shalt.err (!%p528_p2)
}
   0x8   :  { %s532_s10 = scalar_lea.vmem %s34_s25, 1024  ;;  %p537_p4 = scmp.lt.s32.totalorder %s34_s25, %s34_s25 }
   0x9   :  { %p533_p3 = scmp.ne.s32.totalorder %s34_s25, %s532_s10  ;;  %p538_p5 = scmp.lt.s32.totalorder %s532_s10, %s532_s10 }
   0xb   :  { %p539_p6 = por %p538_p5, %p537_p4 }
   0xd   :  { %p540_p7 = pnand %p539_p6, %p533_p3 }
   0xf   :  { %543 = shalt.err (!%p540_p7)
}
  0x10   :  { %s593_s11 = smov 64   ;;  %s594_s12 = smov 4  }
  0x11   :  { %39 = dma.hbm_to_vmem [thread:$0]  %s729_s3, 1024, %s34_s25, [#allocation5], %s593_s11, %s593_s11, %s594_s12  }
  0x12   :  { %s595_s15 = smov [#allocation2]   ;;  %s596_s17 = smov [#allocation6]  }
  0x13   :  { %s20_s16 = sshll.u32 %s595_s15, 4  ;;  %s47_s18 = sshll.u32 %s596_s17, 4  ;;  %s21_s16 = int_to_ptr.vmem [resolvable:$true] %s20_s16  ;;  %s48_s18 = int_to_ptr.vmem [resolvable:$true] %s47_s18 }
  0x14   :  { %s544_s21 = scalar_lea.hbm %s726_s0, 128 }
  0x15   :  { %p545_p8 = scmp.ne.s32.totalorder %s726_s0, %s544_s21  ;;  %p548_p9 = scmp.lt.u32.totalorder %s544_s21, %s726_s0 }
  0x17   :  { %p550_p10 = pnand %p548_p9, %p545_p8 }
  0x19   :  { %553 = shalt.err (!%p550_p10)
}
  0x1a   :  { %s554_s3 = scalar_lea.vmem %s21_s16, 128  ;;  %p559_p12 = scmp.lt.s32.totalorder %s21_s16, %s21_s16 }
  0x1b   :  { %p555_p11 = scmp.ne.s32.totalorder %s21_s16, %s554_s3  ;;  %p560_p13 = scmp.lt.s32.totalorder %s554_s3, %s554_s3 }
  0x1d   :  { %p561_p0 = por %p560_p13, %p559_p12 }
  0x1f   :  { %p562_p1 = pnand %p561_p0, %p555_p11 }
  0x21   :  { %565 = shalt.err (!%p562_p1)
}
  0x22   :  { %23 = dma.hbm_to_vmem [thread:$0]  %s726_s0, 128, %s21_s16, [#allocation3]  }
  0x23   :  { %s566_s30 = scalar_lea.hbm %s731_s5, 1024 }
  0x24   :  { %p567_p2 = scmp.ne.s32.totalorder %s731_s5, %s566_s30  ;;  %p570_p3 = scmp.lt.u32.totalorder %s566_s30, %s731_s5 }
  0x26   :  { %p572_p4 = pnand %p570_p3, %p567_p2 }
  0x28   :  { %575 = shalt.err (!%p572_p4)
}
  0x29   :  { %s576_s14 = scalar_lea.vmem %s48_s18, 1024  ;;  %p581_p6 = scmp.lt.s32.totalorder %s48_s18, %s48_s18 }
  0x2a   :  { %p577_p5 = scmp.ne.s32.totalorder %s48_s18, %s576_s14  ;;  %p582_p7 = scmp.lt.s32.totalorder %s576_s14, %s576_s14 }
  0x2c   :  { %p583_p8 = por %p582_p7, %p581_p6 }
  0x2e   :  { %p584_p9 = pnand %p583_p8, %p577_p5 }
  0x30   :  { %587 = shalt.err (!%p584_p9)
}
  0x31   :  { %53 = dma.hbm_to_vmem [thread:$0]  %s731_s5, 1024, %s48_s18, [#allocation5], %s593_s11, %s593_s11, %s594_s12  }
  0x32   :  { %588 = dma.done.wait [#allocation3], 128  }
  0x33   :  { %589 = vsyncadd [#allocation3], 4294967168 }
  0x34   :  { %590 = dma.done.wait [#allocation5], 2048  }
  0x35   :  { %591 = vsyncadd [#allocation5], 4294965248  ;;  %v597_v0 = vmov 0.0   ;;  %vm598_vm0 = vmmov 0   ;;  %v494_v1 = vld [vmem:[%s727_s1] sm:$0xff]   ;;  %v495_v2 = vld [vmem:[%s727_s1 + $0x8] sm:$0xff]   ;;  %v361_v37 = vlaneseq }
  0x36   :  { %439 = vmatprep.subr.bf16.mxu0 %v597_v0  ;;  %443 = vmatprep.mubr.msk.bf16.mxu0 %vm598_vm0, %v597_v0  ;;  %v66_v3 = vld [vmem:[#allocation2] sm:$0xff]  ;;  %v496_v4 = vld [vmem:[#allocation4] sm:$0xff]   ;;  %v497_v6 = vld [vmem:[#allocation4 + $0x8] sm:$0xff]   ;;  %vm91_vm1 = vcmask 261120  }
  0x37   :  { %447 = vmatprep.subr.bf16.mxu1 %v597_v0  ;;  %463 = vmatprep.mubr.msk.bf16.mxu1 %vm598_vm0, %v597_v0  ;;  %v67_v5 = vpack.c.bf16 %v66_v3, %v66_v3  ;;  %v498_v7 = vld [vmem:[#allocation4 + $0x10] sm:$0xff]   ;;  %v499_v8 = vld [vmem:[#allocation4 + $0x18] sm:$0xff]   ;;  %v500_v9 = vld [vmem:[#allocation4 + $0x20] sm:$0xff]   ;;  %v362_v38 = vand.u32 127, %v361_v37 }
  0x38   :  { %440 = vmatpush3.bf16.msra.mxu0 %v494_v1  ;;  %448 = vmatpush3.bf16.msra.mxu1 %v496_v4  ;;  %v501_v10 = vld [vmem:[#allocation4 + $0x28] sm:$0xff]   ;;  %v502_v11 = vld [vmem:[#allocation4 + $0x30] sm:$0xff]   ;;  %v503_v12 = vld [vmem:[#allocation4 + $0x38] sm:$0xff]  }
  0x39   :  { %441 = vmatprep.subr.bf16.mxu0 %v597_v0  ;;  %449 = vmatprep.subr.bf16.mxu1 %v597_v0  ;;  %v504_v13 = vld [vmem:[#allocation6] sm:$0xff]   ;;  %v505_v14 = vld [vmem:[#allocation6 + $0x8] sm:$0xff]   ;;  %v506_v15 = vld [vmem:[#allocation6 + $0x10] sm:$0xff]   ;;  %vm363_vm2 = vcmp.lt.s32.totalorder %v362_v38, 8  ;;  %vm383_vm3 = vcmp.eq.s32.totalorder %v362_v38, 8  ;;  %vm386_vm4 = vcmp.eq.s32.totalorder %v362_v38, 9 }
  0x3a   :  { %v507_v16 = vld [vmem:[#allocation6 + $0x18] sm:$0xff]   ;;  %v508_v25 = vld [vmem:[#allocation6 + $0x20] sm:$0xff]   ;;  %v509_v26 = vld [vmem:[#allocation6 + $0x28] sm:$0xff]  }
  0x3b   :  { %v396_v17 = vld [vmem:[%s728_s2] ss:$0 sm:$0xff]  ;;  %v510_v27 = vld [vmem:[#allocation6 + $0x30] sm:$0xff]  }
  0x3c   :  { %442 = vmatpush3.bf16.msra.mxu0 %v495_v2  ;;  %450 = vmatpush3.bf16.msra.mxu1 %v497_v6  ;;  %v511_v28 = vld [vmem:[#allocation6 + $0x38] sm:$0xff]  }
  0x3d   :  { %467 = vmatprep.subr.bf16.mxu0 %v597_v0  ;;  %451 = vmatprep.subr.bf16.mxu1 %v597_v0  ;;  %v400_v29 = vld [vmem:[%s730_s4] ss:$0 sm:$0xff] }
  0x3e   :  { %v409_v39 = vld [vmem:[%s732_s6] ss:$0 sm:$0xff] }
  0x3f   :  { %444 = vmatmul.mubr.msk.bf16.vlgmr.msra.gmra.mrb[0].mxu0 %vm91_vm1, %v67_v5 }
  0x40   :  { %483 = vmatprep.mubr.msk.bf16.mxu0 %vm598_vm0, %v597_v0  ;;  %452 = vmatpush3.bf16.msra.mxu1 %v498_v7 }
  0x41   :  { %453 = vmatprep.subr.bf16.mxu1 %v597_v0  ;;  %468 = vmatpush3.bf16.msra.mxu0 %v504_v13 }
  0x42   :  { %469 = vmatprep.subr.bf16.mxu0 %v597_v0 }
  0x44   :  { %454 = vmatpush3.bf16.msra.mxu1 %v499_v8 }
  0x45   :  { %455 = vmatprep.subr.bf16.mxu1 %v597_v0  ;;  %470 = vmatpush3.bf16.msra.mxu0 %v505_v14 }
  0x46   :  { %471 = vmatprep.subr.bf16.mxu0 %v597_v0 }
  0x48   :  { %456 = vmatpush3.bf16.msra.mxu1 %v500_v9 }
  0x49   :  { %457 = vmatprep.subr.bf16.mxu1 %v597_v0  ;;  %472 = vmatpush3.bf16.msra.mxu0 %v506_v15 }
  0x4a   :  { %473 = vmatprep.subr.bf16.mxu0 %v597_v0 }
  0x4c   :  { %458 = vmatpush3.bf16.msra.mxu1 %v501_v10 }
  0x4d   :  { %459 = vmatprep.subr.bf16.mxu1 %v597_v0  ;;  %474 = vmatpush3.bf16.msra.mxu0 %v507_v16 }
  0x4e   :  { %475 = vmatprep.subr.bf16.mxu0 %v597_v0 }
  0x50   :  { %460 = vmatpush3.bf16.msra.mxu1 %v502_v11 }
  0x51   :  { %461 = vmatprep.subr.bf16.mxu1 %v597_v0  ;;  %476 = vmatpush3.bf16.msra.mxu0 %v508_v25 }
  0x52   :  { %477 = vmatprep.subr.bf16.mxu0 %v597_v0 }
  0x54   :  { %462 = vmatpush3.bf16.msra.mxu1 %v503_v12 }
  0x55   :  { %478 = vmatpush3.bf16.msra.mxu0 %v509_v26 }
  0x56   :  { %479 = vmatprep.subr.bf16.mxu0 %v597_v0 }
  0x59   :  { %480 = vmatpush3.bf16.msra.mxu0 %v510_v27 }
  0x5a   :  { %481 = vmatprep.subr.bf16.mxu0 %v597_v0 }
  0x5d   :  { %482 = vmatpush3.bf16.msra.mxu0 %v511_v28 }
 0x112   :  { %v129_v18 = vpop.f32.mrb[0].mxu0 }
 0x113   :  { %v130_v19 = vadd.f32 %v396_v17, %v129_v18  ;;  %v445_v20 = vpop.f32.mrb[1].mxu0 }
 0x114   :  { %v132_v21 = vpop.f32.mrb[2].mxu0 }
 0x115   :  { %512 = vtanh.f32 %v130_v19  ;;  %v446_v22 = vpop.f32.mrb[3].mxu0 }
 0x11f   :  { %v513_v23 = vpop.eup %512 }
 0x120   :  { %v136_v24 = vpack.c.bf16 %v513_v23, %v513_v23 }
 0x122   :  { %464 = vmatmul.mubr.bf16.vlgmr.msra.gmra.mrb[0].mxu1 %v136_v24 }
 0x1f5   :  { %v242_v30 = vpop.f32.mrb[0].mxu1 }
 0x1f6   :  { %v243_v31 = vadd.f32 %v400_v29, %v242_v30  ;;  %v465_v32 = vpop.f32.mrb[1].mxu1 }
 0x1f7   :  { %v245_v33 = vpop.f32.mrb[2].mxu1 }
 0x1f8   :  { %514 = vtanh.f32 %v243_v31  ;;  %v466_v34 = vpop.f32.mrb[3].mxu1 }
 0x202   :  { %v515_v35 = vpop.eup %514 }
 0x203   :  { %v249_v36 = vpack.c.bf16 %v515_v35, %v515_v35 }
 0x205   :  { %484 = vmatmul.mubr.bf16.vlgmr.msra.gmra.mrb[4].mxu0 %v249_v36 }
 0x2d8   :  { %v355_v40 = vpop.f32.mrb[4].mxu0 }
 0x2d9   :  { %v356_v41 = vadd.f32 %v409_v39, %v355_v40  ;;  %v485_v42 = vpop.f32.mrb[5].mxu0 }
 0x2da   :  { %v358_v43 = vpop.f32.mrb[6].mxu0 }
 0x2db   :  { %v486_v44 = vpop.f32.mrb[7].mxu0  ;;  %v364_v45 = vsel %vm363_vm2, %v356_v41, -1e+30  ;;  %v387_v63 = vsel %vm386_vm4, %v356_v41, 0.0 }
 0x2dc   :  { %365 = vmax.xlane.f32.xlu0 %v364_v45 }
 0x369   :  { %v366_v46 = vpop.xlane.xlu0 %365 }
 0x36a   :  { %v367_v47 = vsub.f32 %v364_v45, %v366_v46 }
 0x36c   :  { %v368_v48 = vmul.f32 1.442695, %v367_v47 }
 0x36e   :  { %516 = vpow2.f32 %v368_v48 }
 0x378   :  { %v517_v49 = vpop.eup %516 }
 0x379   :  { %v370_v50 = vsel %vm363_vm2, %v517_v49, 0.0 }
 0x37a   :  { %371 = vadd.xlane.f32.xlu0 %v370_v50  ;;  %v377_v51 = vmul.f32 %v370_v50, %v367_v47 }
 0x37c   :  { %378 = vadd.xlane.f32.xlu1 %v377_v51 }
 0x407   :  { %v372_v52 = vpop.xlane.xlu0 %371 }
 0x408   :  { %518 = vlog2.f32 %v372_v52 }
 0x409   :  { %520 = vrcp.f32 %v372_v52  ;;  %v379_v56 = vpop.xlane.xlu1 %378 }
 0x412   :  { %v519_v53 = vpop.eup %518 }
 0x413   :  { %v521_v54 = vpop.eup %520  ;;  %v374_v55 = vmul.f32 0.6931472, %v519_v53 }
 0x414   :  { %v380_v57 = vmul.f32 %v521_v54, %v379_v56 }
 0x415   :  { %v375_v58 = vsub.f32 %v367_v47, %v374_v55 }
 0x416   :  { %v381_v59 = vsub.f32 %v374_v55, %v380_v57 }
 0x417   :  { %v382_v60 = vsel %vm363_vm2, %v375_v58, 0.0 }
 0x418   :  { %v384_v61 = vsel %vm383_vm3, %v381_v59, 0.0 }
 0x419   :  { %v385_v62 = vadd.f32 %v384_v61, %v382_v60 }
 0x41b   :  { %v388_v0 = vadd.f32 %v387_v63, %v385_v62 }
 0x41d   :  { %389 = vst [vmem:[%s733_s7] sm:$0xff] %v388_v0 }
 0x41e   :  { %394 = vsyncpa [#allocation3], 1 }
 0x41f   :  { %395 = vsyncpa [#allocation5], 1 }

</bundles_post_ra>
